<compile_context>
chip_gen: v7x
topology: tpu7x:2x2x1
jax: 0.10.0
libtpu: 0.0.40
codegen_flags: <defaults>
</compile_context>

<pallas_src>
import jax
import jax.numpy as jnp
from jax.experimental import pallas as pl
from jax.experimental.pallas import tpu as pltpu


def _round_up(x, m):
    return (x + m - 1) // m * m


# ----------------------------------------------------------------------------
# Fused kernel:
#   enc      = relu(x @ W_enc + b_enc)          (W_enc = [W_mu | W_logvar])
#   mu       = enc[:, :Z]        (z = mu, eval-mode reparameterize)
#   decoded  = relu(mu @ W_dec + b_dec)
# ----------------------------------------------------------------------------
def _vae_fused_kernel(x_ref, wenc_ref, benc_ref, wd_ref, bd_ref,
                      dec_ref, enc_ref):
    x = x_ref[...]                                     # (tm, D) bf16
    enc = jnp.dot(x, wenc_ref[...],
                  preferred_element_type=jnp.float32)  # (tm, 2Z) f32 acc
    enc = jnp.maximum(enc + benc_ref[...], 0.0)
    enc_ref[...] = enc                                 # mu || logvar, lane=2Z

    z = wd_ref.shape[0]
    mu = enc[:, :z]                                    # z = mu (no noise)
    dec = jnp.dot(mu.astype(wd_ref.dtype), wd_ref[...],
                  preferred_element_type=jnp.float32)
    dec_ref[...] = jnp.maximum(dec + bd_ref[...], 0.0)


def _compute_tiling(m, d, z, *, vmem_budget_bytes=24 << 20, max_tile_m=4096):
    """Pick (tile_m, padded_m, n_tiles) from a per-step VMEM byte budget."""
    m8 = _round_up(max(m, 1), 8)
    # Per-row VMEM bytes of the M-tiled streams (double-buffered):
    #   x bf16: 2*2*d, decoded f32: 2*4*d, enc (mu||lv) f32: 2*4*2z
    per_row = 4 * d + 8 * d + 16 * z
    # Resident weights/biases (bf16 weights, f32 biases), assume 2 buffers.
    weight_bytes = 2 * (2 * (d * 2 * z) + 2 * (z * d)) + 2 * 4 * (2 * z + d)
    avail = max(vmem_budget_bytes - weight_bytes, per_row * 8)
    tile_cap = max((avail // per_row) // 8 * 8, 8)
    tile_cap = min(tile_cap, max_tile_m)

    n_tiles = pl.cdiv(m8, tile_cap)
    # Give v7x's second TensorCore work when there are enough rows.
    if n_tiles == 1 and m8 >= 16:
        n_tiles = 2
    tm = _round_up(pl.cdiv(m8, n_tiles), 8)   # balanced tiles -> tiny padding
    mp = tm * n_tiles
    footprint = per_row * tm + weight_bytes
    return tm, mp, n_tiles, footprint


def simple_linear_forward(x, params, *, max_tile_m=4096):
    """Forward pass of SimpleLinear (eval mode).

    x: (batch, H, W) float array.
    params: weights laid out as (in_features, out_features), 1-D biases.
    Returns (decoded, mu, logvar); decoded.shape == x.shape.
    """
    input_shape = x.shape
    batch = x.shape[0]
    d = 1
    for s in x.shape[1:]:
        d *= s

    # Matmul operands in bf16 (f32 accumulation), elementwise math in f32.
    w_mu = params["w_mu"]
    w_lv = params["w_logvar"]
    z = w_mu.shape[1]
    w_enc = jnp.concatenate([w_mu, w_lv], axis=1).astype(jnp.bfloat16)  # (D,2Z)
    b_enc = jnp.concatenate([params["b_mu"], params["b_logvar"]]
                            ).astype(jnp.float32).reshape(1, 2 * z)
    w_dec = params["w_dec"].astype(jnp.bfloat16)                        # (Z,D)
    b_dec = params["b_dec"].astype(jnp.float32).reshape(1, d)

    xv = x.reshape(batch, d).astype(jnp.bfloat16)

    tm, mp, n_tiles, footprint = _compute_tiling(batch, d, z,
                                                 max_tile_m=max_tile_m)
    if mp > batch:
        xv = jnp.pad(xv, ((0, mp - batch), (0, 0)))

    # Scoped-VMEM limit: >= default everywhere, <= 48 MiB (safe on v7x 64 MiB).
    vmem_limit = int(min(max(4 * footprint, 16 << 20), 48 << 20))

    flops = 6 * mp * d * z                  # (mp,d)@(d,2z) + (mp,z)@(z,d)
    bytes_accessed = (2 * mp * d            # x in (bf16)
                      + 4 * mp * d          # decoded out (f32)
                      + 4 * mp * 2 * z      # mu||logvar out (f32)
                      + 2 * (3 * d * z)     # weights (bf16)
                      + 4 * (2 * z + d))    # biases (f32)

    dec, enc = pl.pallas_call(
        _vae_fused_kernel,
        out_shape=(
            jax.ShapeDtypeStruct((mp, d), jnp.float32),
            jax.ShapeDtypeStruct((mp, 2 * z), jnp.float32),
        ),
        grid=(n_tiles,),
        in_specs=[
            pl.BlockSpec((tm, d), lambda i: (i, 0)),        # x tile (pipelined)
            pl.BlockSpec((d, 2 * z), lambda i: (0, 0)),     # W_enc (resident)
            pl.BlockSpec((1, 2 * z), lambda i: (0, 0)),     # b_enc
            pl.BlockSpec((z, d), lambda i: (0, 0)),         # W_dec (resident)
            pl.BlockSpec((1, d), lambda i: (0, 0)),         # b_dec
        ],
        out_specs=(
            pl.BlockSpec((tm, d), lambda i: (i, 0)),        # decoded (lane-dense)
            pl.BlockSpec((tm, 2 * z), lambda i: (i, 0)),    # mu || logvar
        ),
        compiler_params=pltpu.CompilerParams(
            dimension_semantics=("parallel",),
            vmem_limit_bytes=vmem_limit),
        cost_estimate=pl.CostEstimate(
            flops=flops, transcendentals=0, bytes_accessed=bytes_accessed),
    )(xv, w_enc, b_enc, w_dec, b_dec)

    decoded = dec[:batch].reshape(input_shape)
    mu = enc[:batch, :z]
    logvar = enc[:batch, z:]
    return decoded, mu, logvar


# ----------------------------------------------------------------------------
# Deterministic parameters (nn.Linear shapes, stored as (in, out) = transpose
# of PyTorch's (out, in) layout).
# ----------------------------------------------------------------------------
def make_params(key, input_size, z_size):
    ks = jax.random.split(key, 6)
    s = 0.05
    return {
        "w_mu": s * jax.random.normal(ks[0], (input_size, z_size), jnp.float32),
        "b_mu": s * jax.random.normal(ks[1], (z_size,), jnp.float32),
        "w_logvar": s * jax.random.normal(ks[2], (input_size, z_size), jnp.float32),
        "b_logvar": s * jax.random.normal(ks[3], (z_size,), jnp.float32),
        "w_dec": s * jax.random.normal(ks[4], (z_size, input_size), jnp.float32),
        "b_dec": s * jax.random.normal(ks[5], (input_size,), jnp.float32),
    }


def _reference(x, params):
    b = x.shape[0]
    d = x.size // b
    xv = x.reshape(b, d)
    mu = jnp.maximum(xv @ params["w_mu"] + params["b_mu"], 0.0)
    lv = jnp.maximum(xv @ params["w_logvar"] + params["b_logvar"], 0.0)
    dec = jnp.maximum(mu @ params["w_dec"] + params["b_dec"], 0.0)
    return dec.reshape(x.shape), mu, lv


if __name__ == "__main__":
    key = jax.random.PRNGKey(0)
    k_x, k_x2, k_p = jax.random.split(key, 3)

    batch, H, W = 2, 16, 16       # input_shape = (16, 16) -> input_size = 256
    z_size = 32
    input_size = H * W

    params = make_params(k_p, input_size, z_size)

    # bf16 matmul operands -> compare against f32 reference with bf16-level tol.
    TOL = dict(atol=2e-2, rtol=2e-2)

    # --- case 1: tiny batch, single grid step --------------------------------
    x = jax.random.normal(k_x, (batch, H, W), jnp.float32)
    decoded, mu, logvar = simple_linear_forward(x, params)
    decoded = jax.block_until_ready(decoded)

    dec_ref, mu_ref, lv_ref = _reference(x, params)
    assert decoded.shape == x.shape
    assert mu.shape == (batch, z_size) and logvar.shape == (batch, z_size)
    assert jnp.allclose(decoded, dec_ref, **TOL)
    assert jnp.allclose(mu, mu_ref, **TOL)
    assert jnp.allclose(logvar, lv_ref, **TOL)
    assert bool(jnp.all(decoded >= 0.0))

    # --- case 2: multi-tile grid + row padding path --------------------------
    batch2 = 40
    x2 = jax.random.normal(k_x2, (batch2, H, W), jnp.float32)
    decoded2, mu2, logvar2 = simple_linear_forward(x2, params, max_tile_m=16)
    decoded2 = jax.block_until_ready(decoded2)

    dec_ref2, mu_ref2, lv_ref2 = _reference(x2, params)
    assert decoded2.shape == x2.shape
    assert jnp.allclose(decoded2, dec_ref2, **TOL)
    assert jnp.allclose(mu2, mu_ref2, **TOL)
    assert jnp.allclose(logvar2, lv_ref2, **TOL)

    print("KERNEL_OK")
</pallas_src>

<mosaic_0001>
module attributes {stable_mosaic.version = 11 : i64} {
  func.func @_vae_fused_kernel(%arg0: i32, %arg1: memref<8x256xbf16, #tpu.memory_space<vmem>>, %arg2: memref<256x64xbf16, #tpu.memory_space<vmem>>, %arg3: memref<1x64xf32, #tpu.memory_space<vmem>>, %arg4: memref<32x256xbf16, #tpu.memory_space<vmem>>, %arg5: memref<1x256xf32, #tpu.memory_space<vmem>>, %arg6: memref<8x256xf32, #tpu.memory_space<vmem>>, %arg7: memref<8x64xf32, #tpu.memory_space<vmem>>) attributes {dimension_semantics = [#tpu.dimension_semantics<parallel>], iteration_bounds = array<i64: 1>, scalar_prefetch = 0 : i64, scratch_operands = 0 : i64, tpu.core_type = #tpu.core_type<tc>, window_params = [{transform_indices = @transform_0, window_bounds = array<i64: 8, 256>}, {pipeline_mode = #tpu.pipeline_mode<synchronous>, transform_indices = @transform_1, window_bounds = array<i64: 256, 64>}, {pipeline_mode = #tpu.pipeline_mode<synchronous>, transform_indices = @transform_2, window_bounds = array<i64: 1, 64>}, {pipeline_mode = #tpu.pipeline_mode<synchronous>, transform_indices = @transform_3, window_bounds = array<i64: 32, 256>}, {pipeline_mode = #tpu.pipeline_mode<synchronous>, transform_indices = @transform_4, window_bounds = array<i64: 1, 256>}, {transform_indices = @transform_5, window_bounds = array<i64: 8, 256>}, {transform_indices = @transform_6, window_bounds = array<i64: 8, 64>}]} {
    %c0 = arith.constant 0 : index
    %c0_0 = arith.constant 0 : index
    %0 = vector.load %arg1[%c0, %c0_0] : memref<8x256xbf16, #tpu.memory_space<vmem>>, vector<8x256xbf16>
    %c0_1 = arith.constant 0 : index
    %c0_2 = arith.constant 0 : index
    %1 = vector.load %arg2[%c0_1, %c0_2] : memref<256x64xbf16, #tpu.memory_space<vmem>>, vector<256x64xbf16>
    %cst = arith.constant dense<0.000000e+00> : vector<8x64xf32>
    %2 = tpu.matmul %0, %1, %cst {dimension_numbers = #tpu.dot_dimension_numbers<[1], [0], [0], [1], [0, 0, 1, 1], [], []>} : vector<8x256xbf16>, vector<256x64xbf16>, vector<8x64xf32> -> vector<8x64xf32>
    %c0_3 = arith.constant 0 : index
    %c0_4 = arith.constant 0 : index
    %3 = vector.load %arg3[%c0_3, %c0_4] : memref<1x64xf32, #tpu.memory_space<vmem>>, vector<1x64xf32>
    %4 = vector.broadcast %3 : vector<1x64xf32> to vector<8x64xf32>
    %5 = arith.addf %2, %4 : vector<8x64xf32>
    %cst_5 = arith.constant 0.000000e+00 : f32
    %6 = vector.broadcast %cst_5 : f32 to vector<8x64xf32>
    %7 = arith.maximumf %5, %6 : vector<8x64xf32>
    %c0_6 = arith.constant 0 : index
    %c0_7 = arith.constant 0 : index
    %8 = vector.load %arg7[%c0_6, %c0_7] : memref<8x64xf32, #tpu.memory_space<vmem>>, vector<8x64xf32>
    tpu.vector_store %arg7[%c0_6, %c0_7], %7 {strides = array<i32>} : memref<8x64xf32, #tpu.memory_space<vmem>>, vector<8x64xf32>,
    %9 = vector.extract_strided_slice %7 {offsets = [0, 0], sizes = [8, 32], strides = [1, 1]} : vector<8x64xf32> to vector<8x32xf32>
    %10 = arith.truncf %9 : vector<8x32xf32> to vector<8x32xbf16>
    %c0_8 = arith.constant 0 : index
    %c0_9 = arith.constant 0 : index
    %11 = vector.load %arg4[%c0_8, %c0_9] : memref<32x256xbf16, #tpu.memory_space<vmem>>, vector<32x256xbf16>
    %cst_10 = arith.constant dense<0.000000e+00> : vector<8x256xf32>
    %12 = tpu.matmul %10, %11, %cst_10 {dimension_numbers = #tpu.dot_dimension_numbers<[1], [0], [0], [1], [0, 0, 1, 1], [], []>} : vector<8x32xbf16>, vector<32x256xbf16>, vector<8x256xf32> -> vector<8x256xf32>
    %c0_11 = arith.constant 0 : index
    %c0_12 = arith.constant 0 : index
    %13 = vector.load %arg5[%c0_11, %c0_12] : memref<1x256xf32, #tpu.memory_space<vmem>>, vector<1x256xf32>
    %14 = vector.broadcast %13 : vector<1x256xf32> to vector<8x256xf32>
    %15 = arith.addf %12, %14 : vector<8x256xf32>
    %cst_13 = arith.constant 0.000000e+00 : f32
    %16 = vector.broadcast %cst_13 : f32 to vector<8x256xf32>
    %17 = arith.maximumf %15, %16 : vector<8x256xf32>
    %c0_14 = arith.constant 0 : index
    %c0_15 = arith.constant 0 : index
    %18 = vector.load %arg6[%c0_14, %c0_15] : memref<8x256xf32, #tpu.memory_space<vmem>>, vector<8x256xf32>
    tpu.vector_store %arg6[%c0_14, %c0_15], %17 {strides = array<i32>} : memref<8x256xf32, #tpu.memory_space<vmem>>, vector<8x256xf32>,
    return
  }
  func.func @transform_0(%arg0: i32) -> (i32, i32) {
    %c0_i32 = arith.constant 0 : i32
    %c0_i32_0 = arith.constant 0 : i32
    return %arg0, %c0_i32 : i32, i32
  }
  func.func @transform_1(%arg0: i32) -> (i32, i32) {
    %c0_i32 = arith.constant 0 : i32
    %c0_i32_0 = arith.constant 0 : i32
    %c0_i32_1 = arith.constant 0 : i32
    return %c0_i32, %c0_i32_0 : i32, i32
  }
  func.func @transform_2(%arg0: i32) -> (i32, i32) {
    %c0_i32 = arith.constant 0 : i32
    %c0_i32_0 = arith.constant 0 : i32
    %c0_i32_1 = arith.constant 0 : i32
    return %c0_i32, %c0_i32_0 : i32, i32
  }
  func.func @transform_3(%arg0: i32) -> (i32, i32) {
    %c0_i32 = arith.constant 0 : i32
    %c0_i32_0 = arith.constant 0 : i32
    %c0_i32_1 = arith.constant 0 : i32
    return %c0_i32, %c0_i32_0 : i32, i32
  }
  func.func @transform_4(%arg0: i32) -> (i32, i32) {
    %c0_i32 = arith.constant 0 : i32
    %c0_i32_0 = arith.constant 0 : i32
    %c0_i32_1 = arith.constant 0 : i32
    return %c0_i32, %c0_i32_0 : i32, i32
  }
  func.func @transform_5(%arg0: i32) -> (i32, i32) {
    %c0_i32 = arith.constant 0 : i32
    %c0_i32_0 = arith.constant 0 : i32
    return %arg0, %c0_i32 : i32, i32
  }
  func.func @transform_6(%arg0: i32) -> (i32, i32) {
    %c0_i32 = arith.constant 0 : i32
    %c0_i32_0 = arith.constant 0 : i32
    return %arg0, %c0_i32 : i32, i32
  }
}

</mosaic_0001>

<bundles_post_ra>
// kernel: tpu_custom_call.1
= control target key start
LH: loop header
LB: loop body
LE: loop exit
PB: predicated region body
PF: predicated region fallthrough
CT: control target
= control target key end

     0   :  { %12 = vsyncpa [#allocation3], 0  ;;  %s577_s0 = inlined_call_operand.vmem [shape: bf16[8,256], index: 0, kind: input, shape index: {}]   ;;  %s578_s1 = inlined_call_operand.vmem [shape: bf16[256,64], index: 1, kind: input, shape index: {}]   ;;  %s579_s2 = inlined_call_operand.vmem [shape: f32[1,64], index: 2, kind: input, shape index: {}]   ;;  %s580_s3 = inlined_call_operand.vmem [shape: bf16[32,256], index: 3, kind: input, shape index: {}]   ;;  %s581_s4 = inlined_call_operand.vmem [shape: f32[1,256], index: 4, kind: input, shape index: {}]   ;;  %s582_s5 = inlined_call_operand.hbm [shape: f32[8,256], index: 5, kind: output, shape index: {0}]   ;;  %s583_s6 = inlined_call_operand.hbm [shape: f32[8,64], index: 6, kind: output, shape index: {1}]  }
   0x1   :  { %v374_v0 = vld [vmem:[%s578_s1 + $0x40] sm:$0xff]   ;;  %v376_v2 = vld [vmem:[%s578_s1 + $0x48] sm:$0xff]   ;;  %v378_v4 = vld [vmem:[%s578_s1 + $0x50] sm:$0xff]  }
   0x2   :  { %v375_v1 = vld [vmem:[%s578_s1] sm:$0xff]   ;;  %349 = vmatprep.subr.bf16.mxu0 %v374_v0  ;;  %v377_v3 = vld [vmem:[%s578_s1 + $0x8] sm:$0xff]   ;;  %v379_v5 = vld [vmem:[%s578_s1 + $0x10] sm:$0xff]  }
   0x3   :  { %350 = vmatpush3.bf16.msra.mxu0 %v375_v1  ;;  %v380_v6 = vld [vmem:[%s578_s1 + $0x58] sm:$0xff]   ;;  %v382_v8 = vld [vmem:[%s578_s1 + $0x60] sm:$0xff]   ;;  %v384_v10 = vld [vmem:[%s578_s1 + $0x68] sm:$0xff]  }
   0x4   :  { %351 = vmatprep.subr.bf16.mxu0 %v376_v2  ;;  %v381_v7 = vld [vmem:[%s578_s1 + $0x18] sm:$0xff]   ;;  %v383_v9 = vld [vmem:[%s578_s1 + $0x20] sm:$0xff]  }
   0x5   :  { %v25_v11 = vld [vmem:[%s577_s0] sm:$0xff] }
   0x6   :  { %v327_v12 = vcombine.high %v25_v11, %v25_v11 }
   0x7   :  { %352 = vmatpush3.bf16.msra.mxu0 %v377_v3 }
   0x8   :  { %353 = vmatprep.subr.bf16.mxu0 %v378_v4 }
   0xb   :  { %354 = vmatpush3.bf16.msra.mxu0 %v379_v5 }
   0xc   :  { %355 = vmatprep.subr.bf16.mxu0 %v380_v6 }
   0xf   :  { %356 = vmatpush3.bf16.msra.mxu0 %v381_v7 }
  0x10   :  { %357 = vmatprep.subr.bf16.mxu0 %v382_v8 }
  0x11   :  { %13 = vsyncpa [#allocation5], 0  ;;  %v385_v13 = vld [vmem:[%s578_s1 + $0x28] sm:$0xff]   ;;  %200 = vmatprep.mubr.bf16.mxu0 %v327_v12  ;;  %v386_v14 = vld [vmem:[%s578_s1 + $0x70] sm:$0xff]   ;;  %v326_v18 = vcombine.low %v25_v11, %v25_v11  ;;  %v446_v23 = vmov 0   ;;  %vm209_vm0 = vcmask 523264  }
  0x12   :  { %v387_v15 = vld [vmem:[%s578_s1 + $0x30] sm:$0xff]   ;;  %v388_v16 = vld [vmem:[%s578_s1 + $0x78] sm:$0xff]   ;;  %v392_v19 = vld [vmem:[%s580_s3 + $0x4] ss:$8 sps:$4 sm:$0xff]   ;;  %284 = vmatprep.mubr.bf16.mxu1 %v446_v23  ;;  %vm248_vm1 = vcmask 261120  }
  0x13   :  { %358 = vmatpush3.bf16.msra.mxu0 %v383_v9  ;;  %v389_v17 = vld [vmem:[%s578_s1 + $0x38] sm:$0xff]   ;;  %v394_v20 = vld [vmem:[%s580_s3] ss:$8 sps:$4 sm:$0xff]   ;;  %252 = vmatprep.subr.bf16.mxu1 %v392_v19 }
  0x14   :  { %359 = vmatprep.subr.bf16.mxu0 %v384_v10  ;;  %253 = vmatpush1.bf16.msra.mxu1 %v394_v20  ;;  %v395_v21 = vld [vmem:[%s580_s3 + $0x14] ss:$8 sps:$4 sm:$0xff]   ;;  %v397_v22 = vld [vmem:[%s580_s3 + $0x10] ss:$8 sps:$4 sm:$0xff]   ;;  %v325_v25 = vld [vmem:[%s579_s2] ss:$0 sm:$0xff] }
  0x15   :  { %254 = vmatprep.subr.bf16.mxu1 %v395_v21  ;;  %s447_s3 = smov [#allocation4]  }
  0x16   :  { %s313_s15 = sshll.u32 %s447_s3, 4  ;;  %s314_s15 = int_to_ptr.vmem [resolvable:$true] %s313_s15 }
  0x17   :  { %360 = vmatpush3.bf16.msra.mxu0 %v385_v13  ;;  %s398_s16 = scalar_lea.vmem %s314_s15, 128  ;;  %p403_p1 = scmp.lt.s32.totalorder %s314_s15, %s314_s15 }
  0x18   :  { %361 = vmatprep.subr.bf16.mxu0 %v386_v14  ;;  %255 = vmatpush1.bf16.msra.mxu1 %v397_v22  ;;  %p399_p0 = scmp.ne.s32.totalorder %s314_s15, %s398_s16  ;;  %p404_p2 = scmp.lt.s32.totalorder %s398_s16, %s398_s16 }
  0x1a   :  { %p405_p3 = por %p404_p2, %p403_p1 }
  0x1b   :  { %362 = vmatpush3.bf16.msra.mxu0 %v387_v15 }
  0x1c   :  { %363 = vmatprep.subr.bf16.mxu0 %v388_v16  ;;  %p406_p4 = pnand %p405_p3, %p399_p0 }
  0x1f   :  { %364 = vmatpush3.bf16.msra.mxu0 %v389_v17 }
  0x22   :  { %201 = vmatmul.mubr.bf16.vlgmr.msra.gmra.mrb[0].mxu0 %v326_v18 }
  0xf5   :  { %v365_v24 = vpop.f32.mrb[0].mxu0 }
  0xf6   :  { %v366_v26 = vpop.f32.mrb[1].mxu0 }
  0xf7   :  { %v367_v27 = vadd.f32 %v366_v26, %v365_v24  ;;  %v368_v28 = vpop.f32.mrb[2].mxu0 }
  0xf8   :  { %v369_v29 = vpop.f32.mrb[3].mxu0 }
  0xf9   :  { %v203_v30 = vadd.f32 %v367_v27, %v325_v25 }
  0xfb   :  { %v208_v31 = vmax.f32 %v203_v30, 0.0 }
  0xfd   :  { %v211_v32 = vpack.c.bf16 %v208_v31, %v208_v31  ;;  %210 = vst.msk [vmem:[#allocation4] sm:$0xff] %vm209_vm0, %v208_v31 }
  0xff   :  { %348 = vmatmul.mubr.msk.bf16.vlgmr.msra.gmra.mrb[0].mxu1 %vm248_vm1, %v211_v32 }
 0x100   :  { %409 = shalt.err (!%p406_p4)
}
 0x101   :  { %s410_s18 = scalar_lea.hbm %s583_s6, 128 }
 0x102   :  { %p411_p5 = scmp.ne.s32.totalorder %s583_s6, %s410_s18  ;;  %p414_p6 = scmp.lt.u32.totalorder %s410_s18, %s583_s6 }
 0x104   :  { %p416_p7 = pnand %p414_p6, %p411_p5 }
 0x106   :  { %419 = shalt.err (!%p416_p7)
}
 0x107   :  { %316 = dma.vmem_to_hbm [thread:$0]  %s314_s15, 128, %s583_s6, [#allocation5]   ;;  %v218_v33 = vlaneseq  ;;  %v216_v36 = vld [vmem:[%s581_s4] sm:$0x3] }
 0x108   :  { %s448_s0 = smov [#allocation2]  }
 0x109   :  { %v219_v34 = vshrl.u32 %v218_v33, 7  ;;  %s303_s27 = sshll.u32 %s448_s0, 4  ;;  %s304_s27 = int_to_ptr.vmem [resolvable:$true] %s303_s27 }
 0x10a   :  { %s420_s6 = scalar_lea.vmem %s304_s27, 256  ;;  %p425_p9 = scmp.lt.s32.totalorder %s304_s27, %s304_s27 }
 0x10b   :  { %v220_v35 = vsub.s32 0, %v219_v34  ;;  %v224_v37 = vsub.s32 1, %v219_v34  ;;  %p421_p8 = scmp.ne.s32.totalorder %s304_s27, %s420_s6  ;;  %p426_p10 = scmp.lt.s32.totalorder %s420_s6, %s420_s6 }
 0x10d   :  { %v221_v38 = vrot.slane %v216_v36, %v220_v35  ;;  %v225_v39 = vrot.slane %v216_v36, %v224_v37  ;;  %p427_p11 = por %p426_p10, %p425_p9 }
 0x10f   :  { %p428_p12 = pnand %p427_p11, %p421_p8 }
 0x1d2   :  { %v286_v40 = vpop.f32.mrb[0].mxu1 }
 0x1d3   :  { %v287_v41 = vadd.f32 %v286_v40, %v221_v38  ;;  %v288_v42 = vpop.f32.mrb[1].mxu1 }
 0x1d4   :  { %v289_v43 = vadd.f32 %v288_v42, %v225_v39  ;;  %v290_v44 = vpop.f32.mrb[2].mxu1 }
 0x1d5   :  { %v293_v45 = vmax.f32 %v287_v41, 0.0  ;;  %v291_v46 = vpop.f32.mrb[3].mxu1 }
 0x1d6   :  { %v294_v47 = vmax.f32 %v289_v43, 0.0 }
 0x1d7   :  { %295 = vst [vmem:[#allocation2] sm:$0xff] %v293_v45 }
 0x1d8   :  { %296 = vst [vmem:[#allocation2 + $0x8] sm:$0xff] %v294_v47 }
 0x1d9   :  { %431 = shalt.err (!%p428_p12)
}
 0x1da   :  { %s432_s29 = scalar_lea.hbm %s582_s5, 256 }
 0x1db   :  { %p433_p13 = scmp.ne.s32.totalorder %s582_s5, %s432_s29  ;;  %p436_p0 = scmp.lt.u32.totalorder %s432_s29, %s582_s5 }
 0x1dd   :  { %p438_p1 = pnand %p436_p0, %p433_p13 }
 0x1df   :  { %441 = shalt.err (!%p438_p1)
}
 0x1e0   :  { %306 = dma.vmem_to_hbm [thread:$0]  %s304_s27, 256, %s582_s5, [#allocation3]  }
 0x1e1   :  { %442 = dma.done.wait [#allocation3], 256  }
 0x1e2   :  { %443 = vsyncadd [#allocation3], 4294967040 }
 0x1e3   :  { %444 = dma.done.wait [#allocation5], 128  }
 0x1e4   :  { %445 = vsyncadd [#allocation5], 4294967168 }
 0x1e5   :  { %323 = vsyncpa [#allocation3], 1 }
 0x1e6   :  { %324 = vsyncpa [#allocation5], 1 }

</bundles_post_ra>
